<compile_context>
chip_gen: v7x
topology: tpu7x:2x2x1
jax: 0.10.0
libtpu: 0.0.40
codegen_flags: <defaults>
</compile_context>

<pallas_src>
import functools
import inspect

import jax
import jax.numpy as jnp
from jax.experimental import pallas as pl
from jax.experimental.pallas import tpu as pltpu


_VMEM_LIMIT = 64 * 1024 * 1024  # deliberate cap; actual usage at these shapes is tiny.

try:
    _HAS_PIPELINE_MODE = (
        hasattr(pl, "Buffered")
        and "pipeline_mode" in inspect.signature(pl.BlockSpec).parameters
    )
except (ValueError, TypeError):
    _HAS_PIPELINE_MODE = False


def _const_weight_spec(shape):
    """BlockSpec for a grid-invariant (weight/bias) block; single-buffered if possible."""
    index_map = lambda *_: (0,) * len(shape)
    if _HAS_PIPELINE_MODE:
        return pl.BlockSpec(shape, index_map, pipeline_mode=pl.Buffered(1))
    return pl.BlockSpec(shape, index_map)


def _round_up(x, m):
    return (x + m - 1) // m * m


# ----------------------------- Pallas kernels ------------------------------ #

def _linear_kernel(x_ref, w_ref, b_ref, o_ref):
    # x, w are bf16; accumulate in f32; bias is f32.
    o_ref[...] = (
        jnp.dot(x_ref[...], w_ref[...], preferred_element_type=jnp.float32)
        + b_ref[...]
    )


def _block_kernel(x_ref, maskadd_ref, wqkv_ref, wu_ref, bu_ref,
                  g1_ref, beta1_ref, w1_ref, b1_ref, w2_ref, b2_ref,
                  g2_ref, beta2_ref, o_ref, *, heads, emb, eps):
    """One whole transformer block for a single batch element (T, emb)."""
    x = x_ref[0]                                   # (T, E) f32 (residual path)
    t = x.shape[0]
    he = heads * emb

    # Fused QKV projection: one bf16 matmul (softmax scale pre-folded into Q weights).
    qkv = jnp.dot(x.astype(jnp.bfloat16), wqkv_ref[...],
                  preferred_element_type=jnp.float32)          # (T, 3*H*E) f32

    # Heads-batched attention: one relayout, then batched contractions over heads.
    qkv = jnp.transpose(qkv.reshape(t, 3 * heads, emb), (1, 0, 2))  # (3H, T, E)
    qkv = qkv.astype(jnp.bfloat16)
    q = qkv[:heads]                                # (H, T, E)
    k = qkv[heads:2 * heads]                       # (H, T, E)
    v = qkv[2 * heads:]                            # (H, T, E)

    # scores (H, T, T) in f32; additive key mask (0 / -1e9) precomputed outside.
    s = jax.lax.dot_general(q, k, (((2,), (2,)), ((0,), (0,))),
                            preferred_element_type=jnp.float32)
    s = s + maskadd_ref[0]                         # (1, T) broadcast over keys
    s = s - jnp.max(s, axis=-1, keepdims=True)
    p = jnp.exp(s)
    p = p * pl.reciprocal(jnp.sum(p, axis=-1, keepdims=True), approx=True)

    ctx = jax.lax.dot_general(p.astype(jnp.bfloat16), v,
                              (((2,), (1,)), ((0,), (0,))),
                              preferred_element_type=jnp.float32)   # (H, T, E)
    att = jnp.transpose(ctx, (1, 0, 2)).reshape(t, he)               # (T, H*E)

    attended = (jnp.dot(att.astype(jnp.bfloat16), wu_ref[...],
                        preferred_element_type=jnp.float32) + bu_ref[...])

    def _ln(z, g, bb):
        mu = jnp.mean(z, axis=-1, keepdims=True)
        var = jnp.mean((z - mu) ** 2, axis=-1, keepdims=True)
        return (z - mu) * jax.lax.rsqrt(var + eps) * g + bb

    # residual + LN1 (f32)
    y = _ln(attended + x, g1_ref[...], beta1_ref[...])
    # feed-forward (bf16 matmuls, f32 accumulate)
    hdn = jnp.dot(y.astype(jnp.bfloat16), w1_ref[...],
                  preferred_element_type=jnp.float32) + b1_ref[...]
    hdn = jnp.maximum(hdn, 0.0)
    ff = jnp.dot(hdn.astype(jnp.bfloat16), w2_ref[...],
                 preferred_element_type=jnp.float32) + b2_ref[...]
    # residual + LN2 (f32)
    o_ref[0] = _ln(ff + y, g2_ref[...], beta2_ref[...])
    # dropout(p=0.0) is identity.


# ------------------------------ wrappers ----------------------------------- #

def pallas_linear(x, w, b, *, row_tile=512):
    """(M,K) f32 @ (K,N) bf16 + (N,) f32 -> (M,N) f32, tiled & pipelined over rows."""
    m, k = x.shape
    _, n = w.shape
    tm = min(row_tile, _round_up(m, 8))        # sublane-aligned row tile
    mp = _round_up(m, tm)                      # pad rows instead of one giant block
    xp = jnp.pad(x, ((0, mp - m), (0, 0))) if mp != m else x
    xp = xp.astype(jnp.bfloat16)               # halves the activation DMA bytes

    out = pl.pallas_call(
        _linear_kernel,
        out_shape=jax.ShapeDtypeStruct((mp, n), jnp.float32),
        grid=(mp // tm,),
        in_specs=[
            pl.BlockSpec((tm, k), lambda i: (i, 0)),
            _const_weight_spec((k, n)),        # single-buffered resident weight
            _const_weight_spec((1, n)),
        ],
        out_specs=pl.BlockSpec((tm, n), lambda i: (i, 0)),
        compiler_params=pltpu.CompilerParams(
            dimension_semantics=("parallel",),
            vmem_limit_bytes=_VMEM_LIMIT),
    )(xp, w, b.reshape(1, n))
    return out[:m] if mp != m else out


def pallas_transformer_block(x, mask_add, blk, *, heads, emb, eps=1e-5):
    b, t, e = x.shape
    he = heads * emb
    kern = functools.partial(_block_kernel, heads=heads, emb=emb, eps=eps)
    return pl.pallas_call(
        kern,
        out_shape=jax.ShapeDtypeStruct((b, t, e), jnp.float32),
        grid=(b,),
        in_specs=[
            pl.BlockSpec((1, t, e), lambda i: (i, 0, 0)),   # x (f32, residual path)
            pl.BlockSpec((1, 1, t), lambda i: (i, 0, 0)),   # additive key mask
            _const_weight_spec((e, 3 * he)),                # fused W_qkv (bf16, Q scaled)
            _const_weight_spec((he, e)),                    # W_unify (bf16)
            _const_weight_spec((1, e)),                     # b_unify
            _const_weight_spec((1, e)),                     # ln1 gamma
            _const_weight_spec((1, e)),                     # ln1 beta
            _const_weight_spec((e, 4 * e)),                 # ff W1 (bf16)
            _const_weight_spec((1, 4 * e)),                 # ff b1
            _const_weight_spec((4 * e, e)),                 # ff W2 (bf16)
            _const_weight_spec((1, e)),                     # ff b2
            _const_weight_spec((1, e)),                     # ln2 gamma
            _const_weight_spec((1, e)),                     # ln2 beta
        ],
        out_specs=pl.BlockSpec((1, t, e), lambda i: (i, 0, 0)),
        compiler_params=pltpu.CompilerParams(
            dimension_semantics=("parallel",),
            vmem_limit_bytes=_VMEM_LIMIT),
    )(x, mask_add, blk["wqkv"], blk["wu"], blk["bu"].reshape(1, e),
      blk["g1"].reshape(1, e), blk["beta1"].reshape(1, e),
      blk["w1"], blk["b1"].reshape(1, 4 * e),
      blk["w2"], blk["b2"].reshape(1, e),
      blk["g2"].reshape(1, e), blk["beta2"].reshape(1, e))


# ----------------------------- model forward -------------------------------- #

def init_params(key, input_dim, emb, heads, depth, output_dim):
    """Returns (kernel_params_bf16, reference_params_f32)."""
    def lin(key, fin, fout, bias=True, scale=0.1):
        kw, kb = jax.random.split(key)
        w = scale * jax.random.normal(kw, (fin, fout), jnp.float32)
        b = (scale * jax.random.normal(kb, (fout,), jnp.float32)
             if bias else jnp.zeros((fout,), jnp.float32))
        return w, b

    keys = jax.random.split(key, 2 + depth)
    tok_w, tok_b = lin(keys[0], input_dim, emb)
    top_w, top_b = lin(keys[1], emb, output_dim)
    q_scale = emb ** -0.5     # (1/e^0.25 on q) * (1/e^0.25 on k) folded into W_q
    blocks, ref_blocks = [], []
    for d in range(depth):
        bk = jax.random.split(keys[2 + d], 6)
        wk, _ = lin(bk[0], emb, emb * heads, bias=False)
        wq, _ = lin(bk[1], emb, emb * heads, bias=False)
        wv, _ = lin(bk[2], emb, emb * heads, bias=False)
        wu, bu = lin(bk[3], heads * emb, emb)
        w1, b1 = lin(bk[4], emb, 4 * emb)
        w2, b2 = lin(bk[5], 4 * emb, emb)
        g1 = jnp.ones((emb,), jnp.float32); beta1 = jnp.zeros((emb,), jnp.float32)
        g2 = jnp.ones((emb,), jnp.float32); beta2 = jnp.zeros((emb,), jnp.float32)
        # Fused QKV weight (Q pre-scaled), cast to bf16 once at init; drop wq/wk/wv.
        wqkv = jnp.concatenate([wq * q_scale, wk, wv], axis=1)   # (emb, 3*heads*emb)
        blocks.append(dict(
            wqkv=wqkv.astype(jnp.bfloat16),
            wu=wu.astype(jnp.bfloat16), bu=bu,
            w1=w1.astype(jnp.bfloat16), b1=b1,
            w2=w2.astype(jnp.bfloat16), b2=b2,
            g1=g1, beta1=beta1, g2=g2, beta2=beta2))
        ref_blocks.append(dict(wq=wq, wk=wk, wv=wv, wu=wu, bu=bu,
                               w1=w1, b1=b1, w2=w2, b2=b2,
                               g1=g1, beta1=beta1, g2=g2, beta2=beta2))
    params = dict(tok_w=tok_w.astype(jnp.bfloat16), tok_b=tok_b,
                  top_w=top_w.astype(jnp.bfloat16), top_b=top_b,
                  blocks=blocks, emb=emb, heads=heads, output_dim=output_dim)
    ref_params = dict(tok_w=tok_w, tok_b=tok_b, top_w=top_w, top_b=top_b,
                      blocks=ref_blocks, emb=emb, heads=heads, output_dim=output_dim)
    return params, ref_params


def transformer_forward(params, x, mask):
    b, t, _ = x.shape
    emb, heads = params["emb"], params["heads"]

    if mask.ndim == 3:
        mask = mask[..., 0]
    # Additive key mask (0 keep / -1e9 masked), computed ONCE outside the kernels.
    mask_add = ((mask.astype(jnp.float32) - 1.0) * 1e9).reshape(b, 1, t)

    tokens = pallas_linear(x.reshape(b * t, -1), params["tok_w"], params["tok_b"])
    tokens = tokens.reshape(b, t, emb)

    xc = tokens
    for blk in params["blocks"]:
        xc = pallas_transformer_block(xc, mask_add, blk, heads=heads, emb=emb)

    out = pallas_linear(xc.reshape(b * t, emb), params["top_w"], params["top_b"])
    out = out.reshape(b, t, params["output_dim"])
    return out, tokens


# --------------------------- pure-JAX reference ------------------------------ #

def reference_forward(params, x, mask):
    b, t, _ = x.shape
    emb, heads = params["emb"], params["heads"]
    if mask.ndim == 3:
        mask = mask[..., 0]
    mask = mask.astype(jnp.float32)

    tokens = x @ params["tok_w"] + params["tok_b"]
    xc = tokens
    for blk in params["blocks"]:
        def split_heads(y):
            return (y.reshape(b, t, heads, emb)
                     .transpose(0, 2, 1, 3)
                     .reshape(b * heads, t, emb))
        k = split_heads(xc @ blk["wk"])
        q = split_heads(xc @ blk["wq"])
        v = split_heads(xc @ blk["wv"])
        scale = emb ** 0.25
        dot = jnp.einsum("zte,zse->zts", q / scale, k / scale)
        m = jnp.repeat(mask, heads, axis=0)[:, None, :]          # (b*h, 1, t)
        dot = jnp.where(m == 0.0, -1e9, dot)
        dot = jax.nn.softmax(dot, axis=-1)
        o = jnp.einsum("zts,zse->zte", dot, v)
        o = o.reshape(b, heads, t, emb).transpose(0, 2, 1, 3).reshape(b, t, heads * emb)
        attended = o @ blk["wu"] + blk["bu"]

        def ln(z, g, bb):
            mu = jnp.mean(z, axis=-1, keepdims=True)
            var = jnp.mean((z - mu) ** 2, axis=-1, keepdims=True)
            return (z - mu) * jax.lax.rsqrt(var + 1e-5) * g + bb

        y = ln(attended + xc, blk["g1"], blk["beta1"])
        ff = jnp.maximum(y @ blk["w1"] + blk["b1"], 0.0) @ blk["w2"] + blk["b2"]
        xc = ln(ff + y, blk["g2"], blk["beta2"])
    out = xc @ params["top_w"] + params["top_b"]
    return out, tokens


# ---------------------------------- main ------------------------------------ #

if __name__ == "__main__":
    B, T = 2, 8
    INPUT_DIM, EMB, HEADS, DEPTH, OUT_DIM = 6, 16, 4, 2, 10

    key = jax.random.PRNGKey(0)
    k_par, k_x, k_m = jax.random.split(key, 3)

    params, ref_params = init_params(k_par, INPUT_DIM, EMB, HEADS, DEPTH, OUT_DIM)
    x = jax.random.normal(k_x, (B, T, INPUT_DIM), jnp.float32)
    mask = (jax.random.uniform(k_m, (B, T)) > 0.3).astype(jnp.float32)
    mask = mask.at[:, 0].set(1.0)   # keep at least one valid key position per batch

    out, tokens = transformer_forward(params, x, mask)
    out = jax.block_until_ready(out)
    tokens = jax.block_until_ready(tokens)

    ref_out, ref_tokens = reference_forward(ref_params, x, mask)
    assert out.shape == (B, T, OUT_DIM) and tokens.shape == (B, T, EMB)
    # bf16 operands / approx reciprocal -> slightly looser tolerance than pure f32.
    assert jnp.allclose(tokens, ref_tokens, rtol=1e-2, atol=1e-2), \
        float(jnp.max(jnp.abs(tokens - ref_tokens)))
    assert jnp.allclose(out, ref_out, rtol=4e-2, atol=4e-2), \
        float(jnp.max(jnp.abs(out - ref_out)))

    print("KERNEL_OK")
</pallas_src>

<mosaic_0001>
module attributes {stable_mosaic.version = 11 : i64} {
  func.func @_linear_kernel(%arg0: i32, %arg1: memref<16x6xbf16, #tpu.memory_space<vmem>>, %arg2: memref<6x16xbf16, #tpu.memory_space<vmem>>, %arg3: memref<1x16xf32, #tpu.memory_space<vmem>>, %arg4: memref<16x16xf32, #tpu.memory_space<vmem>>) attributes {dimension_semantics = [#tpu.dimension_semantics<parallel>], iteration_bounds = array<i64: 1>, scalar_prefetch = 0 : i64, scratch_operands = 0 : i64, tpu.core_type = #tpu.core_type<tc>, window_params = [{transform_indices = @transform_0, window_bounds = array<i64: 16, 6>}, {pipeline_mode = #tpu.pipeline_mode<synchronous>, transform_indices = @transform_1, window_bounds = array<i64: 6, 16>}, {pipeline_mode = #tpu.pipeline_mode<synchronous>, transform_indices = @transform_2, window_bounds = array<i64: 1, 16>}, {transform_indices = @transform_3, window_bounds = array<i64: 16, 16>}]} {
    %c0 = arith.constant 0 : index
    %c0_0 = arith.constant 0 : index
    %0 = vector.load %arg1[%c0, %c0_0] : memref<16x6xbf16, #tpu.memory_space<vmem>>, vector<16x6xbf16>
    %c0_1 = arith.constant 0 : index
    %c0_2 = arith.constant 0 : index
    %1 = vector.load %arg2[%c0_1, %c0_2] : memref<6x16xbf16, #tpu.memory_space<vmem>>, vector<6x16xbf16>
    %cst = arith.constant dense<0.000000e+00> : vector<16x16xf32>
    %2 = tpu.matmul %0, %1, %cst {dimension_numbers = #tpu.dot_dimension_numbers<[1], [0], [0], [1], [0, 0, 1, 1], [], []>} : vector<16x6xbf16>, vector<6x16xbf16>, vector<16x16xf32> -> vector<16x16xf32>
    %c0_3 = arith.constant 0 : index
    %c0_4 = arith.constant 0 : index
    %3 = vector.load %arg3[%c0_3, %c0_4] : memref<1x16xf32, #tpu.memory_space<vmem>>, vector<1x16xf32>
    %4 = vector.broadcast %3 : vector<1x16xf32> to vector<16x16xf32>
    %5 = arith.addf %2, %4 : vector<16x16xf32>
    %c0_5 = arith.constant 0 : index
    %c0_6 = arith.constant 0 : index
    %6 = vector.load %arg4[%c0_5, %c0_6] : memref<16x16xf32, #tpu.memory_space<vmem>>, vector<16x16xf32>
    tpu.vector_store %arg4[%c0_5, %c0_6], %5 {strides = array<i32>} : memref<16x16xf32, #tpu.memory_space<vmem>>, vector<16x16xf32>,
    return
  }
  func.func @transform_0(%arg0: i32) -> (i32, i32) {
    %c0_i32 = arith.constant 0 : i32
    %c0_i32_0 = arith.constant 0 : i32
    return %arg0, %c0_i32 : i32, i32
  }
  func.func @transform_1(%arg0: i32) -> (i32, i32) {
    %c0_i32 = arith.constant 0 : i32
    %c0_i32_0 = arith.constant 0 : i32
    %c0_i32_1 = arith.constant 0 : i32
    return %c0_i32, %c0_i32_0 : i32, i32
  }
  func.func @transform_2(%arg0: i32) -> (i32, i32) {
    %c0_i32 = arith.constant 0 : i32
    %c0_i32_0 = arith.constant 0 : i32
    %c0_i32_1 = arith.constant 0 : i32
    return %c0_i32, %c0_i32_0 : i32, i32
  }
  func.func @transform_3(%arg0: i32) -> (i32, i32) {
    %c0_i32 = arith.constant 0 : i32
    %c0_i32_0 = arith.constant 0 : i32
    return %arg0, %c0_i32 : i32, i32
  }
}

</mosaic_0001>

<bundles_post_ra>
// kernel: tpu_custom_call.1
= control target key start
LH: loop header
LB: loop body
LE: loop exit
PB: predicated region body
PF: predicated region fallthrough
CT: control target
= control target key end

     0   :  { %8 = vsyncpa [#allocation3], 0  ;;  %s339_s0 = inlined_call_operand.hbm [shape: bf16[16,6], index: 0, kind: input, shape index: {}]   ;;  %s340_s1 = inlined_call_operand.hbm [shape: bf16[6,16], index: 1, kind: input, shape index: {}]   ;;  %s341_s2 = inlined_call_operand.hbm [shape: f32[1,16], index: 2, kind: input, shape index: {}]   ;;  %s342_s3 = inlined_call_operand.hbm [shape: f32[16,16], index: 3, kind: output, shape index: {}]  }
   0x1   :  { %9 = vsyncpa [#allocation6], 0 }
   0x2   :  { %10 = vsyncpa [#allocation4], 0  ;;  %s254_s12 = smov [#allocation5]   ;;  %s255_s14 = smov [#allocation2]  }
   0x3   :  { %s29_s13 = sshll.u32 %s254_s12, 4  ;;  %s16_s15 = sshll.u32 %s255_s14, 4  ;;  %s30_s13 = int_to_ptr.vmem [resolvable:$true] %s29_s13  ;;  %s284_s15 = int_to_ptr.vmem [resolvable:$true] %s16_s15 }
   0x4   :  { %s160_s18 = scalar_lea.hbm %s340_s1, 64 }
   0x5   :  { %p161_p0 = scmp.ne.s32.totalorder %s340_s1, %s160_s18  ;;  %p164_p1 = scmp.lt.u32.totalorder %s160_s18, %s340_s1 }
   0x7   :  { %p166_p2 = pnand %p164_p1, %p161_p0 }
   0x9   :  { %169 = shalt.err (!%p166_p2)
}
   0xa   :  { %s170_s23 = scalar_lea.vmem %s30_s13, 64  ;;  %p175_p4 = scmp.lt.s32.totalorder %s30_s13, %s30_s13 }
   0xb   :  { %p171_p3 = scmp.ne.s32.totalorder %s30_s13, %s170_s23  ;;  %p176_p5 = scmp.lt.s32.totalorder %s170_s23, %s170_s23 }
   0xd   :  { %p177_p6 = por %p176_p5, %p175_p4 }
   0xf   :  { %p178_p7 = pnand %p177_p6, %p171_p3 }
  0x11   :  { %181 = shalt.err (!%p178_p7)
}
  0x12   :  { %32 = dma.hbm_to_vmem [thread:$0]  %s340_s1, 64, %s30_s13, [#allocation6]  }
  0x13   :  { %s182_s28 = scalar_lea.hbm %s339_s0, 128 }
  0x14   :  { %p183_p8 = scmp.ne.s32.totalorder %s339_s0, %s182_s28  ;;  %p186_p9 = scmp.lt.u32.totalorder %s182_s28, %s339_s0 }
  0x16   :  { %p188_p10 = pnand %p186_p9, %p183_p8 }
  0x18   :  { %191 = shalt.err (!%p188_p10)
}
  0x19   :  { %s192_s6 = scalar_lea.vmem %s284_s15, 128  ;;  %p197_p12 = scmp.lt.s32.totalorder %s284_s15, %s284_s15 }
  0x1a   :  { %p193_p11 = scmp.ne.s32.totalorder %s284_s15, %s192_s6  ;;  %p198_p13 = scmp.lt.s32.totalorder %s192_s6, %s192_s6 }
  0x1c   :  { %p199_p0 = por %p198_p13, %p197_p12 }
  0x1e   :  { %p200_p1 = pnand %p199_p0, %p193_p11 }
  0x20   :  { %203 = shalt.err (!%p200_p1)
}
  0x21   :  { %s256_s1 = smov 64   ;;  %s257_s7 = smov 4  }
  0x22   :  { %22 = dma.hbm_to_vmem [thread:$0]  %s339_s0, 128, %s284_s15, [#allocation3], %s256_s1, %s256_s1, %s257_s7  }
  0x23   :  { %s258_s10 = smov [#allocation7]   ;;  %s204_s14 = scalar_lea.hbm %s341_s2, 16 }
  0x24   :  { %s39_s11 = sshll.u32 %s258_s10, 4  ;;  %p205_p2 = scmp.ne.s32.totalorder %s341_s2, %s204_s14  ;;  %s40_s11 = int_to_ptr.vmem [resolvable:$true] %s39_s11 }
  0x25   :  { %p208_p3 = scmp.lt.u32.totalorder %s204_s14, %s341_s2 }
  0x27   :  { %p210_p4 = pnand %p208_p3, %p205_p2 }
  0x29   :  { %213 = shalt.err (!%p210_p4)
}
  0x2a   :  { %s214_s20 = scalar_lea.vmem %s40_s11, 16  ;;  %s218_s0 = scalar_lea.vmem %s40_s11, 32 }
  0x2b   :  { %p215_p5 = scmp.ne.s32.totalorder %s40_s11, %s214_s20  ;;  %p219_p6 = scmp.lt.s32.totalorder %s40_s11, %s40_s11 }
  0x2c   :  { %p220_p7 = scmp.lt.s32.totalorder %s218_s0, %s214_s20 }
  0x2e   :  { %p221_p8 = por %p220_p7, %p219_p6 }
  0x30   :  { %p222_p9 = pnand %p221_p8, %p215_p5 }
  0x32   :  { %225 = shalt.err (!%p222_p9)
}
  0x33   :  { %42 = dma.hbm_to_vmem [thread:$0]  %s341_s2, 16, %s40_s11, [#allocation6]  }
  0x34   :  { %248 = dma.done.wait [#allocation3], 128  }
  0x35   :  { %249 = vsyncadd [#allocation3], 4294967168 }
  0x36   :  { %250 = dma.done.wait [#allocation6], 80  }
  0x37   :  { %251 = vsyncadd [#allocation6], 4294967216  ;;  %v259_v0 = vmov 0.0   ;;  %vm260_vm0 = vmmov 0   ;;  %vm72_vm1 = vcmask 1042432   ;;  %v159_v3 = vld [vmem:[#allocation2] sm:$0xff]  }
  0x38   :  { %143 = vmatprep.subr.bf16.mxu0 %v259_v0  ;;  %145 = vmatprep.mubr.msk.bf16.mxu0 %vm260_vm0, %v259_v0  ;;  %v55_v1 = vld [vmem:[#allocation5] sm:$0x7]  ;;  %vm68_vm2 = vcmask 48128   ;;  %v138_v4 = vld [vmem:[#allocation7] ss:$0 sm:$0xff]  ;;  %s261_s22 = smov [#allocation8]  }
  0x39   :  { %v74_v2 = vsel %vm72_vm1, %v55_v1, 0  ;;  %s125_s23 = sshll.u32 %s261_s22, 4  ;;  %vm117_vm3 = vcmask 130048   ;;  %s126_s23 = int_to_ptr.vmem [resolvable:$true] %s125_s23 }
  0x3a   :  { %144 = vmatpush3.bf16.msra.mxu0 %v74_v2  ;;  %s226_s2 = scalar_lea.vmem %s126_s23, 256  ;;  %p231_p11 = scmp.lt.s32.totalorder %s126_s23, %s126_s23 }
  0x3b   :  { %p227_p10 = scmp.ne.s32.totalorder %s126_s23, %s226_s2  ;;  %p232_p12 = scmp.lt.s32.totalorder %s226_s2, %s226_s2 }
  0x3d   :  { %146 = vmatmul.mubr.msk.bf16.vlgmr.msra.gmra.mrb[0].mxu0 %vm68_vm2, %v159_v3  ;;  %p233_p13 = por %p232_p12, %p231_p11 }
  0x3f   :  { %p234_p0 = pnand %p233_p13, %p227_p10 }
 0x110   :  { %v110_v5 = vpop.f32.mrb[0].mxu0 }
 0x111   :  { %v111_v6 = vadd.f32 %v138_v4, %v110_v5  ;;  %v147_v7 = vpop.f32.mrb[1].mxu0 }
 0x112   :  { %v113_v8 = vpop.f32.mrb[2].mxu0 }
 0x113   :  { %118 = vst.msk [vmem:[#allocation8] sm:$0xff] %vm117_vm3, %v111_v6  ;;  %v114_v9 = vadd.f32 %v138_v4, %v113_v8  ;;  %v148_v10 = vpop.f32.mrb[3].mxu0 }
 0x115   :  { %119 = vst.msk [vmem:[#allocation8 + $0x8] sm:$0xff] %vm117_vm3, %v114_v9 }
 0x116   :  { %237 = shalt.err (!%p234_p0)
}
 0x117   :  { %s238_s26 = scalar_lea.hbm %s342_s3, 256 }
 0x118   :  { %p239_p1 = scmp.ne.s32.totalorder %s342_s3, %s238_s26  ;;  %p242_p2 = scmp.lt.u32.totalorder %s238_s26, %s342_s3 }
 0x11a   :  { %p244_p3 = pnand %p242_p2, %p239_p1 }
 0x11c   :  { %247 = shalt.err (!%p244_p3)
}
 0x11d   :  { %s262_s4 = smov 128   ;;  %s263_s5 = smov 8  }
 0x11e   :  { %131 = dma.vmem_to_hbm [thread:$0]  %s126_s23, 256, %s342_s3, [#allocation4], %s262_s4, %s262_s4, %s263_s5  }
 0x11f   :  { %252 = dma.done.wait [#allocation4], 256  }
 0x120   :  { %253 = vsyncadd [#allocation4], 4294967040 }
 0x121   :  { %135 = vsyncpa [#allocation3], 1 }
 0x122   :  { %136 = vsyncpa [#allocation6], 1 }
 0x123   :  { %137 = vsyncpa [#allocation4], 1 }

</bundles_post_ra>
